<compile_context>
chip_gen: v7x
topology: tpu7x:2x2x1
jax: 0.10.0
libtpu: 0.0.40
codegen_flags: <defaults>
</compile_context>

<pallas_src>
import numpy as np

import jax
import jax.numpy as jnp
from jax.experimental import pallas as pl
from jax.experimental.pallas import tpu as pltpu


# --------------------------------------------------------------------------
# Constant averaging operator: A[t, j] = (1/K) * #{ s in [-pad, pad] :
#                                           clamp(t+s, 0, L-1) == j }
# This is exactly "replicate-pad by (K-1)//2 on both sides, then AvgPool1d(K,
# stride=1)" expressed as a (L, L) matrix acting on the time axis.
# --------------------------------------------------------------------------
def _make_avg_matrix(seq_len: int, kernel_size: int) -> np.ndarray:
    pad = (kernel_size - 1) // 2
    a = np.zeros((seq_len, seq_len), dtype=np.float32)
    inv_k = 1.0 / float(kernel_size)
    for t in range(seq_len):
        for s in range(-pad, pad + 1):
            j = min(max(t + s, 0), seq_len - 1)
            a[t, j] += inv_k
    return a


# ------------------------------ Pallas kernel ------------------------------
def _decomp_kernel(x_ref, avg_ref, res_ref, mean_ref):
    """x_ref: (B, L, D), avg_ref: (L, L); res_ref / mean_ref: (B, L, D)."""
    a = avg_ref[...]                                   # (L, L), loaded once
    batch = x_ref.shape[0]
    for b in range(batch):                             # static unroll (B is tiny)
        xb = x_ref[b]                                  # (L, D)
        mean = jnp.dot(a, xb, preferred_element_type=jnp.float32)  # MXU
        mean_ref[b] = mean.astype(mean_ref.dtype)
        res_ref[b] = (xb.astype(jnp.float32) - mean).astype(res_ref.dtype)


# ------------------------------ wrapper ------------------------------------
def series_decomp(x, kernel_size: int):
    """Pallas equivalent of series_decomp(kernel_size).forward(x) -> (res, mean)."""
    assert kernel_size % 2 == 1, "replicate-padding scheme assumes odd kernel_size"
    b, l, d = x.shape
    avg = jnp.asarray(_make_avg_matrix(l, kernel_size))

    vmem = pl.BlockSpec(memory_space=pltpu.MemorySpace.VMEM)
    res, mean = pl.pallas_call(
        _decomp_kernel,
        out_shape=(jax.ShapeDtypeStruct((b, l, d), x.dtype),
                   jax.ShapeDtypeStruct((b, l, d), x.dtype)),
        in_specs=[vmem, vmem],
        out_specs=(vmem, vmem),
    )(x, avg)
    return res, mean


# ------------------------------ pure-JAX reference --------------------------
def ref_series_decomp(x, kernel_size: int):
    pad = (kernel_size - 1) // 2
    front = jnp.repeat(x[:, :1, :], pad, axis=1)
    end = jnp.repeat(x[:, -1:, :], pad, axis=1)
    xp = jnp.concatenate([front, x, end], axis=1)
    l = x.shape[1]
    mean = sum(xp[:, k:k + l, :] for k in range(kernel_size)) / kernel_size
    return x - mean, mean


# ------------------------------ main ----------------------------------------
if __name__ == "__main__":
    B, L, D = 2, 16, 32          # batch, seq len, channels
    K = 5                        # moving-average kernel size (odd)

    key = jax.random.PRNGKey(0)
    x = jax.random.normal(key, (B, L, D), jnp.float32)

    res, mean = series_decomp(x, K)
    res = jax.block_until_ready(res)
    mean = jax.block_until_ready(mean)

    ref_res, ref_mean = ref_series_decomp(x, K)

    assert res.shape == (B, L, D) and mean.shape == (B, L, D)
    assert jnp.allclose(mean, ref_mean, rtol=1e-5, atol=1e-5)
    assert jnp.allclose(res, ref_res, rtol=1e-5, atol=1e-5)

    print("KERNEL_OK")
</pallas_src>

<mosaic_0001>
module attributes {stable_mosaic.version = 11 : i64} {
  func.func @_decomp_kernel(%arg0: memref<2x16x32xf32, #tpu.memory_space<vmem>>, %arg1: memref<16x16xf32, #tpu.memory_space<vmem>>, %arg2: memref<2x16x32xf32, #tpu.memory_space<vmem>>, %arg3: memref<2x16x32xf32, #tpu.memory_space<vmem>>) attributes {dimension_semantics = [], scalar_prefetch = 0 : i64, scratch_operands = 0 : i64, tpu.core_type = #tpu.core_type<tc>} {
    %c0 = arith.constant 0 : index
    %c0_0 = arith.constant 0 : index
    %0 = vector.load %arg1[%c0, %c0_0] : memref<16x16xf32, #tpu.memory_space<vmem>>, vector<16x16xf32>
    %c0_1 = arith.constant 0 : index
    %c0_2 = arith.constant 0 : index
    %c0_3 = arith.constant 0 : index
    %1 = vector.load %arg0[%c0_1, %c0_2, %c0_3] : memref<2x16x32xf32, #tpu.memory_space<vmem>>, vector<1x16x32xf32>
    %2 = vector.shape_cast %1 : vector<1x16x32xf32> to vector<16x32xf32>
    %cst = arith.constant dense<0.000000e+00> : vector<16x32xf32>
    %3 = tpu.matmul %0, %2, %cst {dimension_numbers = #tpu.dot_dimension_numbers<[1], [0], [0], [1], [0, 0, 1, 1], [], []>} : vector<16x16xf32>, vector<16x32xf32>, vector<16x32xf32> -> vector<16x32xf32>
    %c0_4 = arith.constant 0 : index
    %c0_5 = arith.constant 0 : index
    %c0_6 = arith.constant 0 : index
    %4 = vector.load %arg3[%c0_4, %c0_5, %c0_6] : memref<2x16x32xf32, #tpu.memory_space<vmem>>, vector<1x16x32xf32>
    %5 = vector.shape_cast %4 : vector<1x16x32xf32> to vector<16x32xf32>
    %6 = vector.shape_cast %3 : vector<16x32xf32> to vector<1x16x32xf32>
    tpu.vector_store %arg3[%c0_4, %c0_5, %c0_6], %6 {strides = array<i32>} : memref<2x16x32xf32, #tpu.memory_space<vmem>>, vector<1x16x32xf32>,
    %7 = arith.subf %2, %3 : vector<16x32xf32>
    %c0_7 = arith.constant 0 : index
    %c0_8 = arith.constant 0 : index
    %c0_9 = arith.constant 0 : index
    %8 = vector.load %arg2[%c0_7, %c0_8, %c0_9] : memref<2x16x32xf32, #tpu.memory_space<vmem>>, vector<1x16x32xf32>
    %9 = vector.shape_cast %8 : vector<1x16x32xf32> to vector<16x32xf32>
    %10 = vector.shape_cast %7 : vector<16x32xf32> to vector<1x16x32xf32>
    tpu.vector_store %arg2[%c0_7, %c0_8, %c0_9], %10 {strides = array<i32>} : memref<2x16x32xf32, #tpu.memory_space<vmem>>, vector<1x16x32xf32>,
    %c1 = arith.constant 1 : index
    %c0_10 = arith.constant 0 : index
    %c0_11 = arith.constant 0 : index
    %11 = vector.load %arg0[%c1, %c0_10, %c0_11] : memref<2x16x32xf32, #tpu.memory_space<vmem>>, vector<1x16x32xf32>
    %12 = vector.shape_cast %11 : vector<1x16x32xf32> to vector<16x32xf32>
    %cst_12 = arith.constant dense<0.000000e+00> : vector<16x32xf32>
    %13 = tpu.matmul %0, %12, %cst_12 {dimension_numbers = #tpu.dot_dimension_numbers<[1], [0], [0], [1], [0, 0, 1, 1], [], []>} : vector<16x16xf32>, vector<16x32xf32>, vector<16x32xf32> -> vector<16x32xf32>
    %c1_13 = arith.constant 1 : index
    %c0_14 = arith.constant 0 : index
    %c0_15 = arith.constant 0 : index
    %14 = vector.load %arg3[%c1_13, %c0_14, %c0_15] : memref<2x16x32xf32, #tpu.memory_space<vmem>>, vector<1x16x32xf32>
    %15 = vector.shape_cast %14 : vector<1x16x32xf32> to vector<16x32xf32>
    %16 = vector.shape_cast %13 : vector<16x32xf32> to vector<1x16x32xf32>
    tpu.vector_store %arg3[%c1_13, %c0_14, %c0_15], %16 {strides = array<i32>} : memref<2x16x32xf32, #tpu.memory_space<vmem>>, vector<1x16x32xf32>,
    %17 = arith.subf %12, %13 : vector<16x32xf32>
    %c1_16 = arith.constant 1 : index
    %c0_17 = arith.constant 0 : index
    %c0_18 = arith.constant 0 : index
    %18 = vector.load %arg2[%c1_16, %c0_17, %c0_18] : memref<2x16x32xf32, #tpu.memory_space<vmem>>, vector<1x16x32xf32>
    %19 = vector.shape_cast %18 : vector<1x16x32xf32> to vector<16x32xf32>
    %20 = vector.shape_cast %17 : vector<16x32xf32> to vector<1x16x32xf32>
    tpu.vector_store %arg2[%c1_16, %c0_17, %c0_18], %20 {strides = array<i32>} : memref<2x16x32xf32, #tpu.memory_space<vmem>>, vector<1x16x32xf32>,
    return
  }
}

</mosaic_0001>

<bundles_post_ra>
// kernel: tpu_custom_call.1
= control target key start
LH: loop header
LB: loop body
LE: loop exit
PB: predicated region body
PF: predicated region fallthrough
CT: control target
= control target key end

     0   :  { %9 = vsyncpa [#allocation3], 0  ;;  %s497_s0 = inlined_call_operand.hbm [shape: f32[2,16,32], index: 0, kind: input, shape index: {}]   ;;  %s498_s1 = inlined_call_operand.hbm [shape: f32[16,16], index: 1, kind: input, shape index: {}]   ;;  %s499_s2 = inlined_call_operand.hbm [shape: f32[2,16,32], index: 2, kind: output, shape index: {0}]   ;;  %s500_s3 = inlined_call_operand.hbm [shape: f32[2,16,32], index: 3, kind: output, shape index: {1}]  }
   0x1   :  { %10 = vsyncpa [#allocation6], 0 }
   0x2   :  { %11 = vsyncpa [#allocation4], 0 }
   0x3   :  { %12 = vsyncpa [#allocation9], 0  ;;  %s392_s12 = smov [#allocation2]   ;;  %s296_s16 = scalar_lea.hbm %s497_s0, 512 }
   0x4   :  { %s18_s13 = sshll.u32 %s392_s12, 4  ;;  %p297_p0 = scmp.ne.s32.totalorder %s497_s0, %s296_s16  ;;  %s19_s13 = int_to_ptr.vmem [resolvable:$true] %s18_s13 }
   0x5   :  { %p300_p1 = scmp.lt.u32.totalorder %s296_s16, %s497_s0 }
   0x7   :  { %p302_p2 = pnand %p300_p1, %p297_p0 }
   0x9   :  { %305 = shalt.err (!%p302_p2)
}
   0xa   :  { %s306_s21 = scalar_lea.vmem %s19_s13, 512  ;;  %p311_p4 = scmp.lt.s32.totalorder %s19_s13, %s19_s13 }
   0xb   :  { %p307_p3 = scmp.ne.s32.totalorder %s19_s13, %s306_s21  ;;  %p312_p5 = scmp.lt.s32.totalorder %s306_s21, %s306_s21 }
   0xd   :  { %p313_p6 = por %p312_p5, %p311_p4 }
   0xf   :  { %p314_p7 = pnand %p313_p6, %p307_p3 }
  0x11   :  { %317 = shalt.err (!%p314_p7)
}
  0x12   :  { %s393_s22 = smov 128   ;;  %s394_s23 = smov 8  }
  0x13   :  { %24 = dma.hbm_to_vmem [thread:$0]  %s497_s0, 512, %s19_s13, [#allocation3], %s393_s22, %s393_s22, %s394_s23  }
  0x14   :  { %s395_s26 = smov [#allocation5]   ;;  %s318_s30 = scalar_lea.hbm %s498_s1, 256 }
  0x15   :  { %s30_s27 = sshll.u32 %s395_s26, 4  ;;  %p319_p8 = scmp.ne.s32.totalorder %s498_s1, %s318_s30  ;;  %s31_s27 = int_to_ptr.vmem [resolvable:$true] %s30_s27 }
  0x16   :  { %p322_p9 = scmp.lt.u32.totalorder %s318_s30, %s498_s1 }
  0x18   :  { %p324_p10 = pnand %p322_p9, %p319_p8 }
  0x1a   :  { %327 = shalt.err (!%p324_p10)
}
  0x1b   :  { %s328_s8 = scalar_lea.vmem %s31_s27, 256  ;;  %p333_p12 = scmp.lt.s32.totalorder %s31_s27, %s31_s27 }
  0x1c   :  { %p329_p11 = scmp.ne.s32.totalorder %s31_s27, %s328_s8  ;;  %p334_p13 = scmp.lt.s32.totalorder %s328_s8, %s328_s8 }
  0x1e   :  { %p335_p0 = por %p334_p13, %p333_p12 }
  0x20   :  { %p336_p1 = pnand %p335_p0, %p329_p11 }
  0x22   :  { %339 = shalt.err (!%p336_p1)
}
  0x23   :  { %36 = dma.hbm_to_vmem [thread:$0]  %s498_s1, 256, %s31_s27, [#allocation6], %s393_s22, %s393_s22, %s394_s23  }
  0x24   :  { %384 = dma.done.wait [#allocation3], 512  }
  0x25   :  { %385 = vsyncadd [#allocation3], 4294966784 }
  0x26   :  { %386 = dma.done.wait [#allocation6], 256  }
  0x27   :  { %387 = vsyncadd [#allocation6], 4294967040  ;;  %vm47_vm0 = vcmask 130048   ;;  %v45_v0 = vld [vmem:[#allocation2] sm:$0xff]  ;;  %v46_v1 = vld [vmem:[#allocation2 + $0x8] sm:$0xff]  ;;  %vm129_vm1 = vcmask 261120  }
  0x28   :  { %v137_v2 = vld [vmem:[#allocation2 + $0x10] sm:$0xff]  ;;  %v282_v3 = vpack.c.bf16 %v46_v1, %v45_v0  ;;  %v138_v4 = vld [vmem:[#allocation2 + $0x18] sm:$0xff]  ;;  %v43_v5 = vld [vmem:[#allocation5] sm:$0xff]  ;;  %s396_s1 = smov [#allocation8]   ;;  %s397_s11 = smov [#allocation7]  }
  0x29   :  { %v286_v6 = vpack.c.bf16 %v138_v4, %v137_v2  ;;  %272 = vmatprep.mubr.msk.f32.mxu0 %vm47_vm0, %v43_v5  ;;  %279 = vmatprep.mubr.msk.f32.mxu1 %vm47_vm0, %v43_v5  ;;  %v44_v7 = vld [vmem:[#allocation5 + $0x8] sm:$0xff]  ;;  %s239_s10 = sshll.u32 %s396_s1, 4  ;;  %s227_s12 = sshll.u32 %s397_s11, 4  ;;  %s240_s10 = int_to_ptr.vmem [resolvable:$true] %s239_s10  ;;  %s457_s12 = int_to_ptr.vmem [resolvable:$true] %s227_s12 }
  0x2a   :  { %283 = vmatprep.subr.bf16.mxu0 %v282_v3  ;;  %s340_s13 = scalar_lea.vmem %s240_s10, 512  ;;  %p345_p3 = scmp.lt.s32.totalorder %s240_s10, %s240_s10 }
  0x2b   :  { %287 = vmatprep.subr.bf16.mxu1 %v286_v6  ;;  %285 = vmatpush3.bf16.msra.mxu0 %v282_v3  ;;  %p341_p2 = scmp.ne.s32.totalorder %s240_s10, %s340_s13  ;;  %p346_p4 = scmp.lt.s32.totalorder %s340_s13, %s340_s13 }
  0x2c   :  { %289 = vmatpush3.bf16.msra.mxu1 %v286_v6 }
  0x2d   :  { %p347_p5 = por %p346_p4, %p345_p3 }
  0x2e   :  { %273 = vmatmul.mubr.msk.f32.vlgmr.msra.gmra.mrb[0].mxu0 %vm47_vm0, %v44_v7 }
  0x2f   :  { %280 = vmatmul.mubr.msk.f32.vlgmr.msra.gmra.mrb[0].mxu1 %vm47_vm0, %v44_v7  ;;  %p348_p6 = pnand %p347_p5, %p341_p2 }
 0x101   :  { %v274_v8 = vpop.f32.mrb[0].mxu0 }
 0x102   :  { %131 = vst.msk [vmem:[#allocation8 + $0x8] sm:$0xff] %vm129_vm1, %v274_v8  ;;  %v133_v9 = vsub.f32 %v46_v1, %v274_v8  ;;  %v281_v10 = vpop.f32.mrb[0].mxu1  ;;  %v120_v11 = vpop.f32.mrb[1].mxu0 }
 0x103   :  { %216 = vst.msk [vmem:[#allocation8 + $0x18] sm:$0xff] %vm129_vm1, %v281_v10  ;;  %v218_v12 = vsub.f32 %v138_v4, %v281_v10  ;;  %130 = vst.msk [vmem:[#allocation8] sm:$0xff] %vm129_vm1, %v120_v11  ;;  %v132_v13 = vsub.f32 %v45_v0, %v120_v11  ;;  %v205_v14 = vpop.f32.mrb[1].mxu1 }
 0x104   :  { %135 = vst.msk [vmem:[#allocation7 + $0x8] sm:$0xff] %vm129_vm1, %v133_v9  ;;  %215 = vst.msk [vmem:[#allocation8 + $0x10] sm:$0xff] %vm129_vm1, %v205_v14  ;;  %v217_v15 = vsub.f32 %v137_v2, %v205_v14 }
 0x105   :  { %221 = vst.msk [vmem:[#allocation7 + $0x18] sm:$0xff] %vm129_vm1, %v218_v12  ;;  %134 = vst.msk [vmem:[#allocation7] sm:$0xff] %vm129_vm1, %v132_v13 }
 0x106   :  { %351 = shalt.err (!%p348_p6)
}
 0x107   :  { %s352_s16 = scalar_lea.hbm %s500_s3, 512 }
 0x108   :  { %p353_p7 = scmp.ne.s32.totalorder %s500_s3, %s352_s16  ;;  %p356_p8 = scmp.lt.u32.totalorder %s352_s16, %s500_s3 }
 0x10a   :  { %p358_p9 = pnand %p356_p8, %p353_p7 }
 0x10c   :  { %361 = shalt.err (!%p358_p9)
}
 0x10d   :  { %245 = dma.vmem_to_hbm [thread:$0]  %s240_s10, 512, %s500_s3, [#allocation9], %s393_s22, %s393_s22, %s394_s23   ;;  %220 = vst.msk [vmem:[#allocation7 + $0x10] sm:$0xff] %vm129_vm1, %v217_v15 }
 0x10e   :  { %s362_s25 = scalar_lea.vmem %s457_s12, 512  ;;  %p367_p11 = scmp.lt.s32.totalorder %s457_s12, %s457_s12 }
 0x10f   :  { %p363_p10 = scmp.ne.s32.totalorder %s457_s12, %s362_s25  ;;  %p368_p12 = scmp.lt.s32.totalorder %s362_s25, %s362_s25 }
 0x111   :  { %p369_p13 = por %p368_p12, %p367_p11 }
 0x113   :  { %p370_p0 = pnand %p369_p13, %p363_p10 }
 0x115   :  { %373 = shalt.err (!%p370_p0)
}
 0x116   :  { %s374_s28 = scalar_lea.hbm %s499_s2, 512 }
 0x117   :  { %p375_p1 = scmp.ne.s32.totalorder %s499_s2, %s374_s28  ;;  %p378_p2 = scmp.lt.u32.totalorder %s374_s28, %s499_s2 }
 0x119   :  { %p380_p3 = pnand %p378_p2, %p375_p1 }
 0x11b   :  { %383 = shalt.err (!%p380_p3)
}
 0x11c   :  { %233 = dma.vmem_to_hbm [thread:$0]  %s457_s12, 512, %s499_s2, [#allocation4], %s393_s22, %s393_s22, %s394_s23  }
 0x11d   :  { %388 = dma.done.wait [#allocation4], 512  }
 0x11e   :  { %389 = vsyncadd [#allocation4], 4294966784 }
 0x11f   :  { %390 = dma.done.wait [#allocation9], 512  }
 0x120   :  { %391 = vsyncadd [#allocation9], 4294966784 }
 0x121   :  { %252 = vsyncpa [#allocation3], 1 }
 0x122   :  { %253 = vsyncpa [#allocation6], 1 }
 0x123   :  { %254 = vsyncpa [#allocation4], 1 }
 0x124   :  { %255 = vsyncpa [#allocation9], 1 }

</bundles_post_ra>
